<compile_context>
chip_gen: v7x
topology: tpu7x:2x2x1
jax: 0.10.0
libtpu: 0.0.40
codegen_flags: <defaults>
</compile_context>

<pallas_src>
import jax
import jax.numpy as jnp
from jax.experimental import pallas as pl
from jax.experimental.pallas import tpu as pltpu

LOG_STD_MIN = -20.0
LOG_STD_MAX = 2.0

H1 = 500          # logical hidden-1 width (as in the PyTorch module)
H1_PAD = 512      # lane-aligned padded hidden-1 width (zero-padded)
H2 = 128
H3 = 128
HEAD_PAD = 128    # each head (mean / log_std) padded to its own 128-lane slab


def _round_up(x, m):
    return (x + m - 1) // m * m


def _cdiv(a, b):
    return -(-a // b)


def _actor_kernel(obs_ref,
                  w1_ref, b1_ref,
                  w2_ref, b2_ref,
                  w3_ref, b3_ref,
                  wh_ref, bh_ref,
                  out_ref):
    # FC1 + relu  (bf16 matmul, f32 accumulate; padded H1 columns stay zero)
    x = obs_ref[...]                                              # bf16 already
    h = jnp.dot(x, w1_ref[...], preferred_element_type=jnp.float32) + b1_ref[...]
    h = jnp.maximum(h, 0.0)                                       # (TB, 512)

    # FC2 + relu  (padded rows of w2 are zero -> identical to K=500)
    h = jnp.dot(h.astype(jnp.bfloat16), w2_ref[...],
                preferred_element_type=jnp.float32) + b2_ref[...]
    h = jnp.maximum(h, 0.0)                                       # (TB, 128)

    # FC3 + tanh
    h = jnp.dot(h.astype(jnp.bfloat16), w3_ref[...],
                preferred_element_type=jnp.float32) + b3_ref[...]
    h = jnp.tanh(h)                                               # (TB, 128)

    # Fused heads: single matmul -> (TB, 256) lane-dense slab.
    #   lanes [0, 128)   -> mean    = tanh(.)
    #   lanes [128, 256) -> log_std = clamp(., LOG_STD_MIN, LOG_STD_MAX)
    # Both stores are full-vreg, 128-lane-aligned (no masked vst).
    head = jnp.dot(h.astype(jnp.bfloat16), wh_ref[...],
                   preferred_element_type=jnp.float32) + bh_ref[...]
    out_ref[:, :HEAD_PAD] = jnp.tanh(head[:, :HEAD_PAD])
    out_ref[:, HEAD_PAD:] = jnp.clip(head[:, HEAD_PAD:], LOG_STD_MIN, LOG_STD_MAX)


def prepare_actor_params(params):
    """Pad H1 500->512 with zeros, pad each head to a 128-lane slab, cast the
    weights to bf16.  Biases stay f32 (added after the f32-accumulated matmul)."""
    d_obs = params["w1"].shape[0]
    d_act = params["wm"].shape[1]

    w1 = jnp.zeros((d_obs, H1_PAD), jnp.float32).at[:, :H1].set(params["w1"])
    b1 = jnp.zeros((1, H1_PAD), jnp.float32).at[:, :H1].set(params["b1"])
    w2 = jnp.zeros((H1_PAD, H2), jnp.float32).at[:H1, :].set(params["w2"])

    # Lane-dense fused head: mean weights in lanes [0, d_act),
    # log_std weights in lanes [HEAD_PAD, HEAD_PAD + d_act); rest zero.
    wh = (jnp.zeros((H3, 2 * HEAD_PAD), jnp.float32)
          .at[:, :d_act].set(params["wm"])
          .at[:, HEAD_PAD:HEAD_PAD + d_act].set(params["ws"]))
    bh = (jnp.zeros((1, 2 * HEAD_PAD), jnp.float32)
          .at[:, :d_act].set(params["bm"])
          .at[:, HEAD_PAD:HEAD_PAD + d_act].set(params["bs"]))

    return dict(
        w1=w1.astype(jnp.bfloat16), b1=b1,
        w2=w2.astype(jnp.bfloat16), b2=params["b2"],
        w3=params["w3"].astype(jnp.bfloat16), b3=params["b3"],
        wh=wh.astype(jnp.bfloat16), bh=bh,
        d_act=d_act,
    )


def _choose_tiling(B, batch_tile):
    """Balanced batch tiles: bounded padding waste, grid >= 2 when B > 8 so
    v7x's two TensorCores both get work."""
    if batch_tile is None:
        batch_tile = 512 if B >= 1024 else 256
    n_steps = max(_cdiv(B, batch_tile), 1)
    if B > 8 and n_steps < 2:
        n_steps = 2                      # split mid-size batches across 2 TCs (v7x)
    tile = _round_up(_cdiv(B, n_steps), 8)
    return tile, n_steps


def actor_forward(obs, prepared, *, batch_tile=None):
    """obs: (B, dim_observation) f32.  prepared: output of prepare_actor_params.

    Returns (mean, log_std), each (B, dim_action) f32."""
    B, d_obs = obs.shape
    d_act = prepared["d_act"]
    d_out = 2 * HEAD_PAD

    tile, n_steps = _choose_tiling(B, batch_tile)
    B_pad = tile * n_steps

    # One-time wrapper-side pad + bf16 cast (amortized over all tiles).
    # NOTE: bf16 obs loses mantissa for poorly scaled observations; keep obs
    # f32 here (and drop the cast) if that matters -- FC1's K dim is tiny.
    obs = obs.astype(jnp.bfloat16)
    if B_pad != B:
        obs = jnp.pad(obs, ((0, B_pad - B), (0, 0)))

    grid = (n_steps,)

    def full_spec(arr):  # whole (2-D) parameter, resident across the batch grid
        return pl.BlockSpec(arr.shape, lambda i: (0, 0))

    in_specs = [
        pl.BlockSpec((tile, d_obs), lambda i: (i, 0)),            # obs tile (bf16)
        full_spec(prepared["w1"]), full_spec(prepared["b1"]),
        full_spec(prepared["w2"]), full_spec(prepared["b2"]),
        full_spec(prepared["w3"]), full_spec(prepared["b3"]),
        full_spec(prepared["wh"]), full_spec(prepared["bh"]),
    ]
    out_specs = pl.BlockSpec((tile, d_out), lambda i: (i, 0))     # mean|log_std slab
    out_shape = jax.ShapeDtypeStruct((B_pad, d_out), jnp.float32)

    flops = 2 * B_pad * (d_obs * H1_PAD + H1_PAD * H2 + H2 * H3 + H3 * d_out)
    transcendentals = B_pad * (H3 + HEAD_PAD)                     # tanh count
    param_keys = ("w1", "b1", "w2", "b2", "w3", "b3", "wh", "bh")
    bytes_accessed = (int(obs.size) * 2
                      + sum(int(prepared[k].size) * prepared[k].dtype.itemsize
                            for k in param_keys)
                      + B_pad * d_out * 4)

    fn = pl.pallas_call(
        _actor_kernel,
        grid_spec=pltpu.PrefetchScalarGridSpec(
            num_scalar_prefetch=0,
            grid=grid,
            in_specs=in_specs,
            out_specs=out_specs,
        ),
        out_shape=out_shape,
        compiler_params=pltpu.CompilerParams(
            dimension_semantics=("parallel",),   # v7x: shards batch grid across both TCs
        ),
        cost_estimate=pl.CostEstimate(
            flops=flops,
            transcendentals=transcendentals,
            bytes_accessed=bytes_accessed,
        ),
    )
    out = fn(obs,
             prepared["w1"], prepared["b1"],
             prepared["w2"], prepared["b2"],
             prepared["w3"], prepared["b3"],
             prepared["wh"], prepared["bh"])
    mean = out[:B, :d_act]
    log_std = out[:B, HEAD_PAD:HEAD_PAD + d_act]
    return mean, log_std


def init_actor_params(key, dim_observation, dim_action):
    """Deterministic synthetic init (PyTorch-Linear-style uniform fan_in bound)."""
    def linear_init(k, fan_in, fan_out):
        kw, kb = jax.random.split(k)
        bound = 1.0 / jnp.sqrt(fan_in)
        w = jax.random.uniform(kw, (fan_in, fan_out), jnp.float32, -bound, bound)
        b = jax.random.uniform(kb, (1, fan_out), jnp.float32, -bound, bound)
        return w, b

    k1, k2, k3, k4, k5 = jax.random.split(key, 5)
    w1, b1 = linear_init(k1, dim_observation, H1)
    w2, b2 = linear_init(k2, H1, H2)
    w3, b3 = linear_init(k3, H2, H3)
    wm, bm = linear_init(k4, H3, dim_action)
    ws, bs = linear_init(k5, H3, dim_action)
    return dict(w1=w1, b1=b1, w2=w2, b2=b2, w3=w3, b3=b3,
                wm=wm, bm=bm, ws=ws, bs=bs)


def actor_ref(obs, p):
    """Pure-JAX f32 reference for sanity checking."""
    h = jnp.maximum(obs @ p["w1"] + p["b1"], 0.0)
    h = jnp.maximum(h @ p["w2"] + p["b2"], 0.0)
    h = jnp.tanh(h @ p["w3"] + p["b3"])
    mean = jnp.tanh(h @ p["wm"] + p["bm"])
    log_std = jnp.clip(h @ p["ws"] + p["bs"], LOG_STD_MIN, LOG_STD_MAX)
    return mean, log_std


if __name__ == "__main__":
    key = jax.random.PRNGKey(0)
    k_param, k_obs = jax.random.split(key)

    batch = 8
    dim_observation = 32
    dim_action = 8

    params = init_actor_params(k_param, dim_observation, dim_action)
    prepared = prepare_actor_params(params)
    obs = jax.random.normal(k_obs, (batch, dim_observation), jnp.float32)

    mean, log_std = actor_forward(obs, prepared)
    mean = jax.block_until_ready(mean)
    log_std = jax.block_until_ready(log_std)

    # Correctness check against the plain-JAX f32 reference (bf16 matmuls ->
    # relaxed tolerance).
    mean_ref, log_std_ref = actor_ref(obs, params)
    assert mean.shape == mean_ref.shape and log_std.shape == log_std_ref.shape
    assert jnp.allclose(mean, mean_ref, atol=2e-2, rtol=2e-2), \
        float(jnp.max(jnp.abs(mean - mean_ref)))
    assert jnp.allclose(log_std, log_std_ref, atol=2e-2, rtol=2e-2), \
        float(jnp.max(jnp.abs(log_std - log_std_ref)))

    # Also exercise the multi-step (grid >= 2) / padded-batch path.
    big_obs = jax.random.normal(k_obs, (260, dim_observation), jnp.float32)
    m2, s2 = actor_forward(big_obs, prepared)
    m2_ref, s2_ref = actor_ref(big_obs, params)
    assert jnp.allclose(jax.block_until_ready(m2), m2_ref, atol=2e-2, rtol=2e-2)
    assert jnp.allclose(jax.block_until_ready(s2), s2_ref, atol=2e-2, rtol=2e-2)

    print("KERNEL_OK")
</pallas_src>

<mosaic_0001>
module attributes {stable_mosaic.version = 11 : i64} {
  func.func @_actor_kernel(%arg0: i32, %arg1: memref<8x32xbf16, #tpu.memory_space<vmem>>, %arg2: memref<32x512xbf16, #tpu.memory_space<vmem>>, %arg3: memref<1x512xf32, #tpu.memory_space<vmem>>, %arg4: memref<512x128xbf16, #tpu.memory_space<vmem>>, %arg5: memref<1x128xf32, #tpu.memory_space<vmem>>, %arg6: memref<128x128xbf16, #tpu.memory_space<vmem>>, %arg7: memref<1x128xf32, #tpu.memory_space<vmem>>, %arg8: memref<128x256xbf16, #tpu.memory_space<vmem>>, %arg9: memref<1x256xf32, #tpu.memory_space<vmem>>, %arg10: memref<8x256xf32, #tpu.memory_space<vmem>>) attributes {dimension_semantics = [#tpu.dimension_semantics<parallel>], iteration_bounds = array<i64: 1>, scalar_prefetch = 0 : i64, scratch_operands = 0 : i64, tpu.core_type = #tpu.core_type<tc>, window_params = [{transform_indices = @transform_0, window_bounds = array<i64: 8, 32>}, {pipeline_mode = #tpu.pipeline_mode<synchronous>, transform_indices = @transform_1, window_bounds = array<i64: 32, 512>}, {pipeline_mode = #tpu.pipeline_mode<synchronous>, transform_indices = @transform_2, window_bounds = array<i64: 1, 512>}, {pipeline_mode = #tpu.pipeline_mode<synchronous>, transform_indices = @transform_3, window_bounds = array<i64: 512, 128>}, {pipeline_mode = #tpu.pipeline_mode<synchronous>, transform_indices = @transform_4, window_bounds = array<i64: 1, 128>}, {pipeline_mode = #tpu.pipeline_mode<synchronous>, transform_indices = @transform_5, window_bounds = array<i64: 128, 128>}, {pipeline_mode = #tpu.pipeline_mode<synchronous>, transform_indices = @transform_6, window_bounds = array<i64: 1, 128>}, {pipeline_mode = #tpu.pipeline_mode<synchronous>, transform_indices = @transform_7, window_bounds = array<i64: 128, 256>}, {pipeline_mode = #tpu.pipeline_mode<synchronous>, transform_indices = @transform_8, window_bounds = array<i64: 1, 256>}, {transform_indices = @transform_9, window_bounds = array<i64: 8, 256>}]} {
    %c0 = arith.constant 0 : index
    %c0_0 = arith.constant 0 : index
    %0 = vector.load %arg1[%c0, %c0_0] : memref<8x32xbf16, #tpu.memory_space<vmem>>, vector<8x32xbf16>
    %c0_1 = arith.constant 0 : index
    %c0_2 = arith.constant 0 : index
    %1 = vector.load %arg2[%c0_1, %c0_2] : memref<32x512xbf16, #tpu.memory_space<vmem>>, vector<32x512xbf16>
    %cst = arith.constant dense<0.000000e+00> : vector<8x512xf32>
    %2 = tpu.matmul %0, %1, %cst {dimension_numbers = #tpu.dot_dimension_numbers<[1], [0], [0], [1], [0, 0, 1, 1], [], []>} : vector<8x32xbf16>, vector<32x512xbf16>, vector<8x512xf32> -> vector<8x512xf32>
    %c0_3 = arith.constant 0 : index
    %c0_4 = arith.constant 0 : index
    %3 = vector.load %arg3[%c0_3, %c0_4] : memref<1x512xf32, #tpu.memory_space<vmem>>, vector<1x512xf32>
    %4 = vector.broadcast %3 : vector<1x512xf32> to vector<8x512xf32>
    %5 = arith.addf %2, %4 : vector<8x512xf32>
    %cst_5 = arith.constant 0.000000e+00 : f32
    %6 = vector.broadcast %cst_5 : f32 to vector<8x512xf32>
    %7 = arith.maximumf %5, %6 : vector<8x512xf32>
    %8 = arith.truncf %7 : vector<8x512xf32> to vector<8x512xbf16>
    %c0_6 = arith.constant 0 : index
    %c0_7 = arith.constant 0 : index
    %9 = vector.load %arg4[%c0_6, %c0_7] : memref<512x128xbf16, #tpu.memory_space<vmem>>, vector<512x128xbf16>
    %cst_8 = arith.constant dense<0.000000e+00> : vector<8x128xf32>
    %10 = tpu.matmul %8, %9, %cst_8 {dimension_numbers = #tpu.dot_dimension_numbers<[1], [0], [0], [1], [0, 0, 1, 1], [], []>} : vector<8x512xbf16>, vector<512x128xbf16>, vector<8x128xf32> -> vector<8x128xf32>
    %c0_9 = arith.constant 0 : index
    %c0_10 = arith.constant 0 : index
    %11 = vector.load %arg5[%c0_9, %c0_10] : memref<1x128xf32, #tpu.memory_space<vmem>>, vector<1x128xf32>
    %12 = vector.broadcast %11 : vector<1x128xf32> to vector<8x128xf32>
    %13 = arith.addf %10, %12 : vector<8x128xf32>
    %cst_11 = arith.constant 0.000000e+00 : f32
    %14 = vector.broadcast %cst_11 : f32 to vector<8x128xf32>
    %15 = arith.maximumf %13, %14 : vector<8x128xf32>
    %16 = arith.truncf %15 : vector<8x128xf32> to vector<8x128xbf16>
    %c0_12 = arith.constant 0 : index
    %c0_13 = arith.constant 0 : index
    %17 = vector.load %arg6[%c0_12, %c0_13] : memref<128x128xbf16, #tpu.memory_space<vmem>>, vector<128x128xbf16>
    %cst_14 = arith.constant dense<0.000000e+00> : vector<8x128xf32>
    %18 = tpu.matmul %16, %17, %cst_14 {dimension_numbers = #tpu.dot_dimension_numbers<[1], [0], [0], [1], [0, 0, 1, 1], [], []>} : vector<8x128xbf16>, vector<128x128xbf16>, vector<8x128xf32> -> vector<8x128xf32>
    %c0_15 = arith.constant 0 : index
    %c0_16 = arith.constant 0 : index
    %19 = vector.load %arg7[%c0_15, %c0_16] : memref<1x128xf32, #tpu.memory_space<vmem>>, vector<1x128xf32>
    %20 = vector.broadcast %19 : vector<1x128xf32> to vector<8x128xf32>
    %21 = arith.addf %18, %20 : vector<8x128xf32>
    %22 = math.tanh %21 : vector<8x128xf32>
    %23 = arith.truncf %22 : vector<8x128xf32> to vector<8x128xbf16>
    %c0_17 = arith.constant 0 : index
    %c0_18 = arith.constant 0 : index
    %24 = vector.load %arg8[%c0_17, %c0_18] : memref<128x256xbf16, #tpu.memory_space<vmem>>, vector<128x256xbf16>
    %cst_19 = arith.constant dense<0.000000e+00> : vector<8x256xf32>
    %25 = tpu.matmul %23, %24, %cst_19 {dimension_numbers = #tpu.dot_dimension_numbers<[1], [0], [0], [1], [0, 0, 1, 1], [], []>} : vector<8x128xbf16>, vector<128x256xbf16>, vector<8x256xf32> -> vector<8x256xf32>
    %c0_20 = arith.constant 0 : index
    %c0_21 = arith.constant 0 : index
    %26 = vector.load %arg9[%c0_20, %c0_21] : memref<1x256xf32, #tpu.memory_space<vmem>>, vector<1x256xf32>
    %27 = vector.broadcast %26 : vector<1x256xf32> to vector<8x256xf32>
    %28 = arith.addf %25, %27 : vector<8x256xf32>
    %29 = vector.extract_strided_slice %28 {offsets = [0, 0], sizes = [8, 128], strides = [1, 1]} : vector<8x256xf32> to vector<8x128xf32>
    %30 = math.tanh %29 : vector<8x128xf32>
    %c0_22 = arith.constant 0 : index
    %c0_23 = arith.constant 0 : index
    %31 = vector.load %arg10[%c0_22, %c0_23] : memref<8x256xf32, #tpu.memory_space<vmem>>, vector<8x128xf32>
    tpu.vector_store %arg10[%c0_22, %c0_23], %30 {strides = array<i32>} : memref<8x256xf32, #tpu.memory_space<vmem>>, vector<8x128xf32>,
    %32 = vector.extract_strided_slice %28 {offsets = [0, 128], sizes = [8, 128], strides = [1, 1]} : vector<8x256xf32> to vector<8x128xf32>
    %cst_24 = arith.constant -2.000000e+01 : f32
    %cst_25 = arith.constant 2.000000e+00 : f32
    %33 = vector.broadcast %cst_24 : f32 to vector<8x128xf32>
    %34 = arith.maximumf %33, %32 : vector<8x128xf32>
    %35 = vector.broadcast %cst_25 : f32 to vector<8x128xf32>
    %36 = arith.minimumf %35, %34 : vector<8x128xf32>
    %c0_26 = arith.constant 0 : index
    %c128 = arith.constant 128 : index
    %37 = vector.load %arg10[%c0_26, %c128] : memref<8x256xf32, #tpu.memory_space<vmem>>, vector<8x128xf32>
    tpu.vector_store %arg10[%c0_26, %c128], %36 {strides = array<i32>} : memref<8x256xf32, #tpu.memory_space<vmem>>, vector<8x128xf32>,
    return
  }
  func.func @transform_0(%arg0: i32) -> (i32, i32) {
    %c0_i32 = arith.constant 0 : i32
    %c0_i32_0 = arith.constant 0 : i32
    return %arg0, %c0_i32 : i32, i32
  }
  func.func @transform_1(%arg0: i32) -> (i32, i32) {
    %c0_i32 = arith.constant 0 : i32
    %c0_i32_0 = arith.constant 0 : i32
    %c0_i32_1 = arith.constant 0 : i32
    return %c0_i32, %c0_i32_0 : i32, i32
  }
  func.func @transform_2(%arg0: i32) -> (i32, i32) {
    %c0_i32 = arith.constant 0 : i32
    %c0_i32_0 = arith.constant 0 : i32
    %c0_i32_1 = arith.constant 0 : i32
    return %c0_i32, %c0_i32_0 : i32, i32
  }
  func.func @transform_3(%arg0: i32) -> (i32, i32) {
    %c0_i32 = arith.constant 0 : i32
    %c0_i32_0 = arith.constant 0 : i32
    %c0_i32_1 = arith.constant 0 : i32
    return %c0_i32, %c0_i32_0 : i32, i32
  }
  func.func @transform_4(%arg0: i32) -> (i32, i32) {
    %c0_i32 = arith.constant 0 : i32
    %c0_i32_0 = arith.constant 0 : i32
    %c0_i32_1 = arith.constant 0 : i32
    return %c0_i32, %c0_i32_0 : i32, i32
  }
  func.func @transform_5(%arg0: i32) -> (i32, i32) {
    %c0_i32 = arith.constant 0 : i32
    %c0_i32_0 = arith.constant 0 : i32
    %c0_i32_1 = arith.constant 0 : i32
    return %c0_i32, %c0_i32_0 : i32, i32
  }
  func.func @transform_6(%arg0: i32) -> (i32, i32) {
    %c0_i32 = arith.constant 0 : i32
    %c0_i32_0 = arith.constant 0 : i32
    %c0_i32_1 = arith.constant 0 : i32
    return %c0_i32, %c0_i32_0 : i32, i32
  }
  func.func @transform_7(%arg0: i32) -> (i32, i32) {
    %c0_i32 = arith.constant 0 : i32
    %c0_i32_0 = arith.constant 0 : i32
    %c0_i32_1 = arith.constant 0 : i32
    return %c0_i32, %c0_i32_0 : i32, i32
  }
  func.func @transform_8(%arg0: i32) -> (i32, i32) {
    %c0_i32 = arith.constant 0 : i32
    %c0_i32_0 = arith.constant 0 : i32
    %c0_i32_1 = arith.constant 0 : i32
    return %c0_i32, %c0_i32_0 : i32, i32
  }
  func.func @transform_9(%arg0: i32) -> (i32, i32) {
    %c0_i32 = arith.constant 0 : i32
    %c0_i32_0 = arith.constant 0 : i32
    return %arg0, %c0_i32 : i32, i32
  }
}

</mosaic_0001>

<bundles_post_ra>
// kernel: tpu_custom_call.1
= control target key start
LH: loop header
LB: loop body
LE: loop exit
PB: predicated region body
PF: predicated region fallthrough
CT: control target
= control target key end

     0   :  { %14 = vsyncpa [#allocation3], 0  ;;  %s1442_s0 = inlined_call_operand.hbm [shape: bf16[8,32], index: 0, kind: input, shape index: {}]   ;;  %s1443_s1 = inlined_call_operand.hbm [shape: bf16[32,512], index: 1, kind: input, shape index: {}]   ;;  %s1444_s2 = inlined_call_operand.vmem [shape: f32[1,512], index: 2, kind: input, shape index: {}]   ;;  %s1445_s3 = inlined_call_operand.hbm [shape: bf16[512,128], index: 3, kind: input, shape index: {}]   ;;  %s1446_s4 = inlined_call_operand.vmem [shape: f32[1,128], index: 4, kind: input, shape index: {}]   ;;  %s1447_s5 = inlined_call_operand.hbm [shape: bf16[128,128], index: 5, kind: input, shape index: {}]   ;;  %s1448_s6 = inlined_call_operand.vmem [shape: f32[1,128], index: 6, kind: input, shape index: {}]   ;;  %s1449_s7 = inlined_call_operand.hbm [shape: bf16[128,256], index: 7, kind: input, shape index: {}]   ;;  %s1450_s8 = inlined_call_operand.vmem [shape: f32[1,256], index: 8, kind: input, shape index: {}]   ;;  %s1451_s9 = inlined_call_operand.hbm [shape: f32[8,256], index: 9, kind: output, shape index: {}]  }
   0x1   :  { %15 = vsyncpa [#allocation6], 0 }
   0x2   :  { %16 = vsyncpa [#allocation9], 0 }
   0x3   :  { %17 = vsyncpa [#allocation4], 0  ;;  %s1270_s30 = smov [#allocation5]   ;;  %s1130_s13 = scalar_lea.hbm %s1443_s1, 1024 }
   0x4   :  { %s33_s10 = sshll.u32 %s1270_s30, 4  ;;  %p1131_p0 = scmp.ne.s32.totalorder %s1443_s1, %s1130_s13  ;;  %s34_s10 = int_to_ptr.vmem [resolvable:$true] %s33_s10 }
   0x5   :  { %p1134_p1 = scmp.lt.u32.totalorder %s1130_s13, %s1443_s1 }
   0x7   :  { %p1136_p2 = pnand %p1134_p1, %p1131_p0 }
   0x9   :  { %1139 = shalt.err (!%p1136_p2)
}
   0xa   :  { %s1140_s18 = scalar_lea.vmem %s34_s10, 1024  ;;  %p1145_p4 = scmp.lt.s32.totalorder %s34_s10, %s34_s10 }
   0xb   :  { %p1141_p3 = scmp.ne.s32.totalorder %s34_s10, %s1140_s18  ;;  %p1146_p5 = scmp.lt.s32.totalorder %s1140_s18, %s1140_s18 }
   0xd   :  { %p1147_p6 = por %p1146_p5, %p1145_p4 }
   0xf   :  { %p1148_p7 = pnand %p1147_p6, %p1141_p3 }
  0x11   :  { %1151 = shalt.err (!%p1148_p7)
}
  0x12   :  { %s1271_s19 = smov 256   ;;  %s1272_s20 = smov 16  }
  0x13   :  { %39 = dma.hbm_to_vmem [thread:$0]  %s1443_s1, 1024, %s34_s10, [#allocation6], %s1271_s19, %s1271_s19, %s1272_s20  }
  0x14   :  { %s1273_s23 = smov [#allocation8]   ;;  %s1274_s25 = smov [#allocation2]  }
  0x15   :  { %s61_s24 = sshll.u32 %s1273_s23, 4  ;;  %s24_s26 = sshll.u32 %s1274_s25, 4  ;;  %s62_s24 = int_to_ptr.vmem [resolvable:$true] %s61_s24  ;;  %s25_s26 = int_to_ptr.vmem [resolvable:$true] %s24_s26 }
  0x16   :  { %s1152_s29 = scalar_lea.hbm %s1447_s5, 1024 }
  0x17   :  { %p1153_p8 = scmp.ne.s32.totalorder %s1447_s5, %s1152_s29  ;;  %p1156_p9 = scmp.lt.u32.totalorder %s1152_s29, %s1447_s5 }
  0x19   :  { %p1158_p10 = pnand %p1156_p9, %p1153_p8 }
  0x1b   :  { %1161 = shalt.err (!%p1158_p10)
}
  0x1c   :  { %s1162_s1 = scalar_lea.vmem %s62_s24, 1024  ;;  %p1167_p12 = scmp.lt.s32.totalorder %s62_s24, %s62_s24 }
  0x1d   :  { %p1163_p11 = scmp.ne.s32.totalorder %s62_s24, %s1162_s1  ;;  %p1168_p13 = scmp.lt.s32.totalorder %s1162_s1, %s1162_s1 }
  0x1f   :  { %p1169_p0 = por %p1168_p13, %p1167_p12 }
  0x21   :  { %p1170_p1 = pnand %p1169_p0, %p1163_p11 }
  0x23   :  { %1173 = shalt.err (!%p1170_p1)
}
  0x24   :  { %s1275_s10 = smov 64   ;;  %s1276_s14 = smov 4  }
  0x25   :  { %67 = dma.hbm_to_vmem [thread:$0]  %s1447_s5, 1024, %s62_s24, [#allocation9], %s1275_s10, %s1275_s10, %s1276_s14  }
  0x26   :  { %s1174_s19 = scalar_lea.hbm %s1442_s0, 64 }
  0x27   :  { %p1175_p2 = scmp.ne.s32.totalorder %s1442_s0, %s1174_s19  ;;  %p1178_p3 = scmp.lt.u32.totalorder %s1174_s19, %s1442_s0 }
  0x29   :  { %p1180_p4 = pnand %p1178_p3, %p1175_p2 }
  0x2b   :  { %1183 = shalt.err (!%p1180_p4)
}
  0x2c   :  { %s1184_s25 = scalar_lea.vmem %s25_s26, 64  ;;  %p1189_p6 = scmp.lt.s32.totalorder %s25_s26, %s25_s26 }
  0x2d   :  { %p1185_p5 = scmp.ne.s32.totalorder %s25_s26, %s1184_s25  ;;  %p1190_p7 = scmp.lt.s32.totalorder %s1184_s25, %s1184_s25 }
  0x2f   :  { %p1191_p8 = por %p1190_p7, %p1189_p6 }
  0x31   :  { %p1192_p9 = pnand %p1191_p8, %p1185_p5 }
  0x33   :  { %1195 = shalt.err (!%p1192_p9)
}
  0x34   :  { %27 = dma.hbm_to_vmem [thread:$0]  %s1442_s0, 64, %s25_s26, [#allocation3]  }
  0x35   :  { %s1277_s27 = smov [#allocation7]   ;;  %s1278_s29 = smov [#allocation10]  }
  0x36   :  { %s47_s28 = sshll.u32 %s1277_s27, 4  ;;  %s75_s30 = sshll.u32 %s1278_s29, 4  ;;  %s48_s28 = int_to_ptr.vmem [resolvable:$true] %s47_s28  ;;  %s76_s30 = int_to_ptr.vmem [resolvable:$true] %s75_s30 }
  0x37   :  { %s1196_s13 = scalar_lea.hbm %s1445_s3, 4096 }
  0x38   :  { %p1197_p10 = scmp.ne.s32.totalorder %s1445_s3, %s1196_s13  ;;  %p1200_p11 = scmp.lt.u32.totalorder %s1196_s13, %s1445_s3 }
  0x3a   :  { %p1202_p12 = pnand %p1200_p11, %p1197_p10 }
  0x3c   :  { %1205 = shalt.err (!%p1202_p12)
}
  0x3d   :  { %s1206_s0 = scalar_lea.vmem %s48_s28, 4096  ;;  %p1211_p0 = scmp.lt.s32.totalorder %s48_s28, %s48_s28 }
  0x3e   :  { %p1207_p13 = scmp.ne.s32.totalorder %s48_s28, %s1206_s0  ;;  %p1212_p1 = scmp.lt.s32.totalorder %s1206_s0, %s1206_s0 }
  0x40   :  { %p1213_p2 = por %p1212_p1, %p1211_p0 }
  0x42   :  { %p1214_p3 = pnand %p1213_p2, %p1207_p13 }
  0x44   :  { %1217 = shalt.err (!%p1214_p3)
}
  0x45   :  { %53 = dma.hbm_to_vmem [thread:$0]  %s1445_s3, 4096, %s48_s28, [#allocation6], %s1275_s10, %s1275_s10, %s1276_s14  }
  0x46   :  { %s1218_s21 = scalar_lea.hbm %s1449_s7, 2048 }
  0x47   :  { %p1219_p4 = scmp.ne.s32.totalorder %s1449_s7, %s1218_s21  ;;  %p1222_p5 = scmp.lt.u32.totalorder %s1218_s21, %s1449_s7 }
  0x49   :  { %p1224_p6 = pnand %p1222_p5, %p1219_p4 }
  0x4b   :  { %1227 = shalt.err (!%p1224_p6)
}
  0x4c   :  { %s1228_s24 = scalar_lea.vmem %s76_s30, 2048  ;;  %p1233_p8 = scmp.lt.s32.totalorder %s76_s30, %s76_s30 }
  0x4d   :  { %p1229_p7 = scmp.ne.s32.totalorder %s76_s30, %s1228_s24  ;;  %p1234_p9 = scmp.lt.s32.totalorder %s1228_s24, %s1228_s24 }
  0x4f   :  { %p1235_p10 = por %p1234_p9, %p1233_p8 }
  0x51   :  { %p1236_p11 = pnand %p1235_p10, %p1229_p7 }
  0x53   :  { %1239 = shalt.err (!%p1236_p11)
}
  0x54   :  { %s1279_s3 = smov 128   ;;  %s1280_s10 = smov 8  }
  0x55   :  { %81 = dma.hbm_to_vmem [thread:$0]  %s1449_s7, 2048, %s76_s30, [#allocation9], %s1279_s3, %s1279_s3, %s1280_s10  }
  0x56   :  { %1262 = dma.done.wait [#allocation3], 64  }
  0x57   :  { %1263 = vsyncadd [#allocation3], 4294967232 }
  0x58   :  { %1264 = dma.done.wait [#allocation6], 5120  }
  0x59   :  { %1265 = vsyncadd [#allocation6], 4294962176 }
  0x5a   :  { %1266 = dma.done.wait [#allocation9], 3072  }
  0x5b   :  { %1267 = vsyncadd [#allocation9], 4294964224  ;;  %v1281_v0 = vmov 0   ;;  %v1050_v1 = vld [vmem:[#allocation5 + $0x4] ss:$16 sps:$4 sm:$0xff]   ;;  %vm171_vm0 = vcmask 261120   ;;  %v111_v43 = vlaneseq }
  0x5c   :  { %207 = vmatprep.mubr.bf16.mxu0 %v1281_v0  ;;  %248 = vmatprep.mubr.bf16.mxu1 %v1281_v0  ;;  %v1052_v2 = vld [vmem:[#allocation5 + $0xc] ss:$16 sps:$4 sm:$0xff]   ;;  %v1054_v3 = vld [vmem:[#allocation5] ss:$16 sps:$4 sm:$0xff]   ;;  %v1055_v4 = vld [vmem:[#allocation5 + $0x8] ss:$16 sps:$4 sm:$0xff]  }
  0x5d   :  { %175 = vmatprep.subr.bf16.mxu0 %v1050_v1  ;;  %216 = vmatprep.subr.bf16.mxu1 %v1052_v2  ;;  %v1056_v5 = vld [vmem:[#allocation5 + $0x24] ss:$16 sps:$4 sm:$0xff]   ;;  %v1058_v6 = vld [vmem:[#allocation5 + $0x2c] ss:$16 sps:$4 sm:$0xff]   ;;  %v1060_v7 = vld [vmem:[#allocation5 + $0x20] ss:$16 sps:$4 sm:$0xff]  }
  0x5e   :  { %176 = vmatpush1.bf16.msra.mxu0 %v1054_v3  ;;  %217 = vmatpush1.bf16.msra.mxu1 %v1055_v4  ;;  %v1061_v8 = vld [vmem:[#allocation5 + $0x28] ss:$16 sps:$4 sm:$0xff]   ;;  %v100_v9 = vld [vmem:[#allocation2] sm:$0xf]  ;;  %v1062_v10 = vld [vmem:[#allocation7 + $0x40] sm:$0xff]   ;;  %v1282_v42 = vmov 0.0  }
  0x5f   :  { %177 = vmatprep.subr.bf16.mxu0 %v1056_v5  ;;  %218 = vmatprep.subr.bf16.mxu1 %v1058_v6  ;;  %v1063_v11 = vld [vmem:[#allocation7 + $0xc0] sm:$0xff]   ;;  %v1066_v14 = vld [vmem:[#allocation7 + $0x48] sm:$0xff]   ;;  %v1070_v18 = vld [vmem:[#allocation7 + $0x50] sm:$0xff]   ;;  %v1403_v44 = vshrl.u32 %v111_v43, 7  ;;  %vm1283_vm1 = vmmov 0  }
  0x60   :  { %v1064_v12 = vld [vmem:[#allocation7] sm:$0xff]   ;;  %v1067_v15 = vld [vmem:[#allocation7 + $0xc8] sm:$0xff]   ;;  %v1071_v19 = vld [vmem:[#allocation7 + $0xd0] sm:$0xff]  }
  0x61   :  { %v1065_v13 = vld [vmem:[#allocation7 + $0x80] sm:$0xff]   ;;  %v1068_v16 = vld [vmem:[#allocation7 + $0x8] sm:$0xff]   ;;  %v1072_v20 = vld [vmem:[#allocation7 + $0x10] sm:$0xff]   ;;  %v113_v45 = vsub.s32 0, %v1403_v44  ;;  %v121_v46 = vsub.s32 2, %v1403_v44  ;;  %v117_v48 = vsub.s32 1, %v1403_v44 }
  0x62   :  { %178 = vmatpush1.bf16.msra.mxu0 %v1060_v7  ;;  %219 = vmatpush1.bf16.msra.mxu1 %v1061_v8  ;;  %v1069_v17 = vld [vmem:[#allocation7 + $0x88] sm:$0xff]   ;;  %v1073_v21 = vld [vmem:[#allocation7 + $0x90] sm:$0xff]   ;;  %v1074_v22 = vld [vmem:[#allocation7 + $0x58] sm:$0xff]   ;;  %v125_v49 = vsub.s32 3, %v1403_v44 }
  0x63   :  { %962 = vmatprep.subr.bf16.mxu0 %v1062_v10  ;;  %984 = vmatprep.subr.bf16.mxu1 %v1063_v11  ;;  %v1075_v23 = vld [vmem:[#allocation7 + $0xd8] sm:$0xff]   ;;  %v1078_v26 = vld [vmem:[#allocation7 + $0x60] sm:$0xff]   ;;  %v1082_v30 = vld [vmem:[#allocation7 + $0x68] sm:$0xff]  }
  0x64   :  { %v1076_v24 = vld [vmem:[#allocation7 + $0x18] sm:$0xff]   ;;  %v1079_v27 = vld [vmem:[#allocation7 + $0xe0] sm:$0xff]   ;;  %v1083_v31 = vld [vmem:[#allocation7 + $0xe8] sm:$0xff]  }
  0x65   :  { %902 = vmatmul.mubr.msk.bf16.vlgmr.msra.gmra.mrb[0].mxu0 %vm171_vm0, %v100_v9  ;;  %903 = vmatmul.mubr.msk.bf16.vlgmr.msra.gmra.mrb[0].mxu1 %vm171_vm0, %v100_v9  ;;  %v1077_v25 = vld [vmem:[#allocation7 + $0x98] sm:$0xff]   ;;  %v1080_v28 = vld [vmem:[#allocation7 + $0x20] sm:$0xff]   ;;  %v1084_v32 = vld [vmem:[#allocation7 + $0x28] sm:$0xff]  }
  0x66   :  { %963 = vmatpush3.bf16.msra.mxu0 %v1064_v12  ;;  %985 = vmatpush3.bf16.msra.mxu1 %v1065_v13  ;;  %v1081_v29 = vld [vmem:[#allocation7 + $0xa0] sm:$0xff]   ;;  %v1085_v33 = vld [vmem:[#allocation7 + $0xa8] sm:$0xff]   ;;  %v1086_v34 = vld [vmem:[#allocation7 + $0x70] sm:$0xff]  }
  0x67   :  { %964 = vmatprep.subr.bf16.mxu0 %v1066_v14  ;;  %986 = vmatprep.subr.bf16.mxu1 %v1067_v15  ;;  %v1087_v35 = vld [vmem:[#allocation7 + $0xf0] sm:$0xff]   ;;  %v1090_v38 = vld [vmem:[#allocation7 + $0x78] sm:$0xff]   ;;  %v1094_v10 = vld [vmem:[#allocation8] sm:$0xff]  }
  0x68   :  { %v1088_v36 = vld [vmem:[#allocation7 + $0x30] sm:$0xff]   ;;  %v1091_v39 = vld [vmem:[#allocation7 + $0xf8] sm:$0xff]   ;;  %v1095_v12 = vld [vmem:[#allocation8 + $0x8] sm:$0xff]  }
  0x69   :  { %v1089_v37 = vld [vmem:[#allocation7 + $0xb0] sm:$0xff]   ;;  %v1092_v40 = vld [vmem:[#allocation7 + $0x38] sm:$0xff]   ;;  %v1098_v15 = vld [vmem:[#allocation8 + $0x20] sm:$0xff]  }
  0x6a   :  { %965 = vmatpush3.bf16.msra.mxu0 %v1068_v16  ;;  %987 = vmatpush3.bf16.msra.mxu1 %v1069_v17  ;;  %v1093_v41 = vld [vmem:[#allocation7 + $0xb8] sm:$0xff]   ;;  %v1096_v13 = vld [vmem:[#allocation8 + $0x10] sm:$0xff]   ;;  %v1099_v16 = vld [vmem:[#allocation8 + $0x28] sm:$0xff]  }
  0x6b   :  { %966 = vmatprep.subr.bf16.mxu0 %v1070_v18  ;;  %988 = vmatprep.subr.bf16.mxu1 %v1071_v19  ;;  %v109_v47 = vld [vmem:[%s1444_s2] sm:$0xf]  ;;  %v1100_v17 = vld [vmem:[#allocation8 + $0x30] sm:$0xff]   ;;  %v1104_v19 = vld [vmem:[#allocation10 + $0x4] ss:$8 sps:$4 sm:$0xff]  }
  0x6c   :  { %v114_v50 = vrot.slane %v109_v47, %v113_v45  ;;  %v122_v51 = vrot.slane %v109_v47, %v121_v46  ;;  %v118_v52 = vrot.slane %v109_v47, %v117_v48  ;;  %v126_v53 = vrot.slane %v109_v47, %v125_v49  ;;  %v1097_v14 = vld [vmem:[#allocation8 + $0x18] sm:$0xff]   ;;  %v1122_v47 = vld [vmem:[#allocation10 + $0x64] ss:$8 sps:$4 sm:$0xff]   ;;  %v1120_v49 = vld [vmem:[#allocation10 + $0x60] ss:$8 sps:$4 sm:$0xff]  }
  0x6d   :  { %v1101_v18 = vld [vmem:[#allocation8 + $0x38] sm:$0xff]  }
  0x6e   :  { %967 = vmatpush3.bf16.msra.mxu0 %v1072_v20  ;;  %989 = vmatpush3.bf16.msra.mxu1 %v1073_v21  ;;  %v1107_v20 = vld [vmem:[#allocation10 + $0x14] ss:$8 sps:$4 sm:$0xff]   ;;  %v1105_v21 = vld [vmem:[#allocation10 + $0x10] ss:$8 sps:$4 sm:$0xff]  }
  0x6f   :  { %968 = vmatprep.subr.bf16.mxu0 %v1074_v22  ;;  %990 = vmatprep.subr.bf16.mxu1 %v1075_v23  ;;  %v1110_v22 = vld [vmem:[#allocation10 + $0x24] ss:$8 sps:$4 sm:$0xff]   ;;  %v1108_v23 = vld [vmem:[#allocation10 + $0x20] ss:$8 sps:$4 sm:$0xff]   ;;  %v1119_v43 = vld [vmem:[#allocation10 + $0x54] ss:$8 sps:$4 sm:$0xff]  }
  0x70   :  { %v1117_v46 = vld [vmem:[#allocation10 + $0x50] ss:$8 sps:$4 sm:$0xff]  }
  0x72   :  { %969 = vmatpush3.bf16.msra.mxu0 %v1076_v24  ;;  %991 = vmatpush3.bf16.msra.mxu1 %v1077_v25  ;;  %v1113_v24 = vld [vmem:[#allocation10 + $0x34] ss:$8 sps:$4 sm:$0xff]   ;;  %v1111_v25 = vld [vmem:[#allocation10 + $0x30] ss:$8 sps:$4 sm:$0xff]  }
  0x73   :  { %970 = vmatprep.subr.bf16.mxu0 %v1078_v26  ;;  %992 = vmatprep.subr.bf16.mxu1 %v1079_v27 }
  0x76   :  { %971 = vmatpush3.bf16.msra.mxu0 %v1080_v28  ;;  %993 = vmatpush3.bf16.msra.mxu1 %v1081_v29  ;;  %v904_v28 = vld [vmem:[%s1446_s4] ss:$0 sm:$0xff] }
  0x77   :  { %972 = vmatprep.subr.bf16.mxu0 %v1082_v30  ;;  %994 = vmatprep.subr.bf16.mxu1 %v1083_v31 }
  0x7a   :  { %973 = vmatpush3.bf16.msra.mxu0 %v1084_v32  ;;  %995 = vmatpush3.bf16.msra.mxu1 %v1085_v33 }
  0x7b   :  { %974 = vmatprep.subr.bf16.mxu0 %v1086_v34  ;;  %996 = vmatprep.subr.bf16.mxu1 %v1087_v35 }
  0x7e   :  { %975 = vmatpush3.bf16.msra.mxu0 %v1088_v36  ;;  %997 = vmatpush3.bf16.msra.mxu1 %v1089_v37 }
  0x7f   :  { %976 = vmatprep.subr.bf16.mxu0 %v1090_v38  ;;  %998 = vmatprep.subr.bf16.mxu1 %v1091_v39 }
  0x82   :  { %977 = vmatpush3.bf16.msra.mxu0 %v1092_v40  ;;  %999 = vmatpush3.bf16.msra.mxu1 %v1093_v41  ;;  %v1116_v41 = vld [vmem:[#allocation10 + $0x44] ss:$8 sps:$4 sm:$0xff]  }
  0x83   :  { %1015 = vmatprep.subr.bf16.mxu0 %v1282_v42  ;;  %831 = vmatprep.subr.bf16.mxu1 %v1104_v19 }
 0x138   :  { %v209_v54 = vpop.f32.mrb[0].mxu0  ;;  %v250_v55 = vpop.f32.mrb[0].mxu1 }
 0x139   :  { %v210_v56 = vadd.f32 %v209_v54, %v114_v50  ;;  %v251_v57 = vadd.f32 %v250_v55, %v122_v51  ;;  %v211_v58 = vpop.f32.mrb[1].mxu0  ;;  %v252_v59 = vpop.f32.mrb[1].mxu1  ;;  %v1125_v50 = vld [vmem:[#allocation10 + $0x74] ss:$8 sps:$4 sm:$0xff]   ;;  %v1123_v51 = vld [vmem:[#allocation10 + $0x70] ss:$8 sps:$4 sm:$0xff]  }
 0x13a   :  { %v212_v60 = vadd.f32 %v211_v58, %v118_v52  ;;  %v253_v61 = vadd.f32 %v252_v59, %v126_v53  ;;  %v213_v62 = vpop.f32.mrb[2].mxu0  ;;  %v254_v63 = vpop.f32.mrb[2].mxu1  ;;  %v937_v52 = vld [vmem:[%s1448_s6] ss:$0 sm:$0xff]  ;;  %s1284_s6 = smov [#allocation11]  }
 0x13b   :  { %v257_v1 = vmax.f32 %v210_v56, 0.0  ;;  %v259_v2 = vmax.f32 %v251_v57, 0.0  ;;  %v214_v3 = vpop.f32.mrb[3].mxu0  ;;  %v255_v4 = vpop.f32.mrb[3].mxu1  ;;  %s883_s13 = sshll.u32 %s1284_s6, 4  ;;  %s884_s13 = int_to_ptr.vmem [resolvable:$true] %s883_s13 }
 0x13c   :  { %v258_v5 = vmax.f32 %v212_v60, 0.0  ;;  %v260_v6 = vmax.f32 %v253_v61, 0.0  ;;  %v739_v60 = vld [vmem:[%s1450_s8] sm:$0x3]  ;;  %s1240_s8 = scalar_lea.vmem %s884_s13, 256  ;;  %p1245_p13 = scmp.lt.s32.totalorder %s884_s13, %s884_s13 }
 0x13d   :  { %v263_v7 = vpack.c.bf16 %v259_v2, %v259_v2  ;;  %v261_v11 = vpack.c.bf16 %v257_v1, %v257_v1  ;;  %v744_v61 = vrot.slane %v739_v60, %v113_v45  ;;  %v748_v62 = vrot.slane %v739_v60, %v117_v48  ;;  %p1241_p12 = scmp.ne.s32.totalorder %s884_s13, %s1240_s8  ;;  %p1246_p0 = scmp.lt.s32.totalorder %s1240_s8, %s1240_s8 }
 0x13e   :  { %v262_v8 = vpack.c.bf16 %v258_v5, %v258_v5  ;;  %v264_v9 = vpack.c.bf16 %v260_v6, %v260_v6 }
 0x13f   :  { %p1247_p1 = por %p1246_p0, %p1245_p13 }
 0x140   :  { %560 = vmatprep.mubr.bf16.mxu0 %v262_v8  ;;  %600 = vmatprep.mubr.bf16.mxu1 %v264_v9 }
 0x141   :  { %561 = vmatmul.mubr.bf16.vlgmr.msra.gmra.mrb[4].mxu0 %v261_v11  ;;  %601 = vmatmul.mubr.bf16.vlgmr.msra.gmra.mrb[4].mxu1 %v263_v7  ;;  %p1248_p2 = pnand %p1247_p1, %p1241_p12 }
 0x142   :  { %1016 = vmatpush3.bf16.msra.mxu0 %v1094_v10  ;;  %863 = vmatprep.mubr.bf16.mxu1 %v1281_v0  ;;  %v1102_v0 = vld [vmem:[#allocation10] ss:$8 sps:$4 sm:$0xff]  }
 0x143   :  { %1017 = vmatprep.subr.bf16.mxu0 %v1282_v42  ;;  %1031 = vmatprep.mubr.msk.bf16.mxu0 %vm1283_vm1, %v1282_v42 }
 0x144   :  { %832 = vmatpush1.bf16.msra.mxu1 %v1102_v0 }
 0x145   :  { %833 = vmatprep.subr.bf16.mxu1 %v1107_v20 }
 0x146   :  { %1018 = vmatpush3.bf16.msra.mxu0 %v1095_v12 }
 0x147   :  { %1019 = vmatprep.subr.bf16.mxu0 %v1282_v42 }
 0x148   :  { %834 = vmatpush1.bf16.msra.mxu1 %v1105_v21 }
 0x149   :  { %835 = vmatprep.subr.bf16.mxu1 %v1110_v22 }
 0x14a   :  { %1020 = vmatpush3.bf16.msra.mxu0 %v1096_v13 }
 0x14b   :  { %1021 = vmatprep.subr.bf16.mxu0 %v1282_v42 }
 0x14c   :  { %836 = vmatpush1.bf16.msra.mxu1 %v1108_v23 }
 0x14d   :  { %837 = vmatprep.subr.bf16.mxu1 %v1113_v24 }
 0x14e   :  { %1022 = vmatpush3.bf16.msra.mxu0 %v1097_v14 }
 0x14f   :  { %1023 = vmatprep.subr.bf16.mxu0 %v1282_v42 }
 0x150   :  { %838 = vmatpush1.bf16.msra.mxu1 %v1111_v25 }
 0x151   :  { %839 = vmatprep.subr.bf16.mxu1 %v1116_v41 }
 0x152   :  { %1024 = vmatpush3.bf16.msra.mxu0 %v1098_v15 }
 0x153   :  { %1025 = vmatprep.subr.bf16.mxu0 %v1282_v42 }
 0x156   :  { %1026 = vmatpush3.bf16.msra.mxu0 %v1099_v16 }
 0x157   :  { %1027 = vmatprep.subr.bf16.mxu0 %v1282_v42 }
 0x15a   :  { %1028 = vmatpush3.bf16.msra.mxu0 %v1100_v17 }
 0x15b   :  { %1029 = vmatprep.subr.bf16.mxu0 %v1282_v42  ;;  %v1114_v42 = vld [vmem:[#allocation10 + $0x40] ss:$8 sps:$4 sm:$0xff]  }
 0x15c   :  { %840 = vmatpush1.bf16.msra.mxu1 %v1114_v42 }
 0x15d   :  { %841 = vmatprep.subr.bf16.mxu1 %v1119_v43 }
 0x15e   :  { %1030 = vmatpush3.bf16.msra.mxu0 %v1101_v18 }
 0x160   :  { %842 = vmatpush1.bf16.msra.mxu1 %v1117_v46 }
 0x161   :  { %843 = vmatprep.subr.bf16.mxu1 %v1122_v47 }
 0x164   :  { %844 = vmatpush1.bf16.msra.mxu1 %v1120_v49 }
 0x165   :  { %845 = vmatprep.subr.bf16.mxu1 %v1125_v50 }
 0x168   :  { %846 = vmatpush1.bf16.msra.mxu1 %v1123_v51 }
 0x214   :  { %v978_v26 = vpop.f32.mrb[4].mxu0  ;;  %v1000_v27 = vpop.f32.mrb[4].mxu1 }
 0x215   :  { %v979_v29 = vpop.f32.mrb[5].mxu0  ;;  %v1001_v30 = vpop.f32.mrb[5].mxu1 }
 0x216   :  { %v980_v31 = vadd.f32 %v979_v29, %v978_v26  ;;  %v1002_v32 = vadd.f32 %v1001_v30, %v1000_v27  ;;  %v981_v33 = vpop.f32.mrb[6].mxu0  ;;  %v1003_v34 = vpop.f32.mrb[6].mxu1 }
 0x217   :  { %v982_v35 = vpop.f32.mrb[7].mxu0  ;;  %v1004_v36 = vpop.f32.mrb[7].mxu1 }
 0x218   :  { %v563_v37 = vadd.f32 %v980_v31, %v904_v28 }
 0x21a   :  { %v603_v38 = vadd.f32 %v1002_v32, %v563_v37 }
 0x21c   :  { %v608_v39 = vmax.f32 %v603_v38, 0.0 }
 0x21e   :  { %v609_v40 = vpack.c.bf16 %v608_v39, %v608_v39 }
 0x220   :  { %1032 = vmatmul.mubr.bf16.vlgmr.msra.gmra.mrb[8].mxu0 %v609_v40 }
 0x2f3   :  { %v715_v53 = vpop.f32.mrb[8].mxu0 }
 0x2f4   :  { %v716_v54 = vadd.f32 %v937_v52, %v715_v53  ;;  %v1033_v55 = vpop.f32.mrb[9].mxu0 }
 0x2f5   :  { %v718_v56 = vpop.f32.mrb[10].mxu0 }
 0x2f6   :  { %1126 = vtanh.f32 %v716_v54  ;;  %v1034_v57 = vpop.f32.mrb[11].mxu0 }
 0x300   :  { %v1127_v58 = vpop.eup %1126 }
 0x301   :  { %v722_v59 = vpack.c.bf16 %v1127_v58, %v1127_v58 }
 0x303   :  { %864 = vmatmul.mubr.bf16.vlgmr.msra.gmra.mrb[8].mxu1 %v722_v59 }
 0x3d6   :  { %v865_v63 = vpop.f32.mrb[8].mxu1 }
 0x3d7   :  { %v866_v1 = vadd.f32 %v865_v63, %v744_v61  ;;  %v867_v2 = vpop.f32.mrb[9].mxu1 }
 0x3d8   :  { %v868_v3 = vadd.f32 %v867_v2, %v748_v62  ;;  %v869_v4 = vpop.f32.mrb[10].mxu1 }
 0x3d9   :  { %1128 = vtanh.f32 %v866_v1  ;;  %v870_v5 = vpop.f32.mrb[11].mxu1 }
 0x3da   :  { %v874_v6 = vmax.f32 %v868_v3, -20.0 }
 0x3dc   :  { %v875_v7 = vmin.f32 %v874_v6, 2.0 }
 0x3de   :  { %876 = vst [vmem:[#allocation11 + $0x8] sm:$0xff] %v875_v7 }
 0x3e3   :  { %v1129_v8 = vpop.eup %1128 }
 0x3e4   :  { %873 = vst [vmem:[#allocation11] sm:$0xff] %v1129_v8 }
 0x3e5   :  { %1251 = shalt.err (!%p1248_p2)
}
 0x3e6   :  { %s1252_s16 = scalar_lea.hbm %s1451_s9, 256 }
 0x3e7   :  { %p1253_p3 = scmp.ne.s32.totalorder %s1451_s9, %s1252_s16  ;;  %p1256_p4 = scmp.lt.u32.totalorder %s1252_s16, %s1451_s9 }
 0x3e9   :  { %p1258_p5 = pnand %p1256_p4, %p1253_p3 }
 0x3eb   :  { %1261 = shalt.err (!%p1258_p5)
}
 0x3ec   :  { %886 = dma.vmem_to_hbm [thread:$0]  %s884_s13, 256, %s1451_s9, [#allocation4]  }
 0x3ed   :  { %1268 = dma.done.wait [#allocation4], 256  }
 0x3ee   :  { %1269 = vsyncadd [#allocation4], 4294967040 }
 0x3ef   :  { %890 = vsyncpa [#allocation3], 1 }
 0x3f0   :  { %891 = vsyncpa [#allocation6], 1 }
 0x3f1   :  { %892 = vsyncpa [#allocation9], 1 }
 0x3f2   :  { %893 = vsyncpa [#allocation4], 1 }

</bundles_post_ra>
